<compile_context>
chip_gen: v7x
topology: tpu7x:2x2x1
jax: 0.10.0
libtpu: 0.0.40
codegen_flags: <defaults>
</compile_context>

<pallas_src>
import functools

import jax
import jax.numpy as jnp
from jax import lax
from jax.experimental import pallas as pl
from jax.experimental.pallas import tpu as pltpu

_LANE = 128
_SUBLANE = 8
_BIG = 1e30  # masks padded codebook rows out of the argmin


def _round_up(x, m):
    return ((x + m - 1) // m) * m


def _vmem_limit_bytes():
    """Scoped-VMEM limit passed to Mosaic (also used for the tile budget)."""
    phys = 64 * 1024 * 1024  # conservative fallback == v7x per-core physical VMEM
    try:
        phys = int(pltpu.get_tpu_info().vmem_capacity_bytes)
    except Exception:  # older jax / query unavailable -> keep the safe fallback
        pass
    # Leave headroom for Mosaic internal scratch and semaphores.
    return int(min(phys * 3 // 4, 96 * 1024 * 1024))


def _choose_tile_n(n_rows, k_pad, d_pad, *, emit_distances, vmem_limit_bytes,
                   num_cores=2):
    """Largest row tile whose full working set fits the scoped VMEM limit."""
    # Single-buffered residents: codebook + ||e||^2.
    resident = 4 * (k_pad * d_pad + k_pad)
    # Per-row bytes: pipeline buffers are double-buffered, temporaries counted once.
    per_row = 4 * (
        2 * d_pad                               # x input tile (2 bufs)
        + 2 * d_pad                             # quantized output tile (2 bufs)
        + (2 * k_pad if emit_distances else 0)  # distances output tile (2 bufs)
        + 4 * k_pad                             # temporaries: xe, d, col iota, one-hot
        + 2 * d_pad                             # temporaries: bf16 copy of x, diff
        + 32)                                   # idx / cnt / sse slack
    budget = int(0.70 * vmem_limit_bytes) - resident
    budget = max(budget, 1 << 20)
    tn = budget // per_row
    if tn >= 512:
        tn = min(2048, (tn // 256) * 256)       # 256-aligned fills the 256x256 MXU
    else:
        tn = max(_LANE, (tn // _LANE) * _LANE)  # 128-aligned keeps idx store lane-dense
    if n_rows > num_cores * _LANE:
        # Keep >= num_cores tiles so the "parallel" axis can split across TCs (v7x).
        per_core = _round_up(-(-n_rows // num_cores), _LANE)
        tn = min(tn, per_core)
    tn = min(tn, _round_up(n_rows, _SUBLANE))
    return int(max(tn, _SUBLANE))


def _vq_tile_kernel(x_ref, e_ref, e2_ref, *out_refs, n_valid, tile_n,
                    dist_matmul_dtype, emit_distances):
    refs = iter(out_refs)
    dist_ref = next(refs) if emit_distances else None
    idx_ref = next(refs)
    q_ref = next(refs)
    cnt_ref = next(refs)
    sse_ref = next(refs)

    x = x_ref[...]                    # (TN, Dp) f32   this tile of flat inputs
    e = e_ref[...]                    # (Kp, Dp) f32   VMEM-resident codebook
    e2 = e2_ref[...]                  # (1, Kp)  f32   ||e||^2, padded cols = +_BIG

    tn, _ = x.shape
    kp = e.shape[0]

    # distances = ||x||^2 + ||e||^2 - 2 x e^T   (cross term on the MXU, bf16 default)
    xe = lax.dot_general(x.astype(dist_matmul_dtype), e.astype(dist_matmul_dtype),
                         (((1,), (1,)), ((), ())),
                         preferred_element_type=jnp.float32)      # (TN, Kp)
    x2 = jnp.sum(x * x, axis=1, keepdims=True)                    # (TN, 1)
    d = x2 + e2 - 2.0 * xe
    if emit_distances:
        dist_ref[...] = d.astype(dist_ref.dtype)

    # First-occurrence argmin (matches torch.argmin tie behaviour).
    # TODO(synk): rows that are all-NaN resolve to index kp (all-zero one-hot).
    col = lax.broadcasted_iota(jnp.int32, (tn, kp), 1)
    dmin = jnp.min(d, axis=1, keepdims=True)
    idx = jnp.min(jnp.where(d == dmin, col, kp), axis=1)          # (TN,)
    idx_ref[...] = idx[None, None, :].astype(jnp.int32)           # lane-dense store

    # Quantized rows via one-hot @ codebook (exact f32 codebook rows).
    # TODO(synk): if profiling shows MXU-bound, replace with a gather of e rows.
    onehot = (col == idx[:, None]).astype(jnp.float32)            # (TN, Kp)
    q = jnp.dot(onehot, e, preferred_element_type=jnp.float32)    # (TN, Dp)
    q_ref[...] = q

    # Per-tile partials; the tiny cross-tile reduction finishes in the wrapper,
    # keeping the N grid axis "parallel".
    row = pl.program_id(0) * tile_n + lax.broadcasted_iota(jnp.int32, (tn, 1), 0)
    valid = (row < n_valid).astype(jnp.float32)                   # masks ragged last tile
    cnt_ref[...] = jnp.sum(onehot * valid, axis=0)[None, None, :]  # (1,1,Kp)
    diff = (q - x) * valid
    sse_ref[...] = jnp.full((1, 1, _LANE), jnp.sum(diff * diff), dtype=jnp.float32)


def vector_quantizer_ema_forward(x, embedding, commitment_cost, *,
                                 bf16_distance_matmul=True,
                                 return_distances=True,
                                 return_encodings=True):
    """Forward pass of VectorQuantizerEMA (eval mode, no pairwise distance lists).

    Args:
      x: (batch, embedding_dim, time) float32 encoder output (NCL).
      embedding: (num_embeddings, embedding_dim) float32 codebook.
      commitment_cost: scalar weighting of the commitment loss.
      bf16_distance_matmul: run the x @ e^T distance matmul in bf16 (~3x MXU
        throughput).  Distances / near-tie argmin may differ from an f32
        reference in low-order bits; set False for bit-comparable distances.
      return_distances: emit the dense (B, T, K) distance matrix (extra
        N*K_pad*4 B of HBM writeback).  None is returned when False.
      return_encodings: return the dense one-hot encodings, rebuilt from the
        indices in the wrapper (never written by the kernel).  None when False.

    Returns (vq_loss, quantized (B,D,T), perplexity, encodings (B,T,K) | None,
             distances (B,T,K) | None, encoding_indices (N,1),
             concatenated_quantized (N,D)).
    """
    B, D, T = x.shape
    K = embedding.shape[0]

    x = x.astype(jnp.float32)
    embedding = embedding.astype(jnp.float32)

    # PyTorch: inputs.permute(1,2,0).contiguous().view(-1, D).
    # NOTE: this is a raw memory reinterpretation of the (D, T, B) tensor (rows
    # mix channel/time/batch), so it cannot be expressed as a rectangular
    # BlockSpec index_map; the transpose+reshape stays outside the kernel.
    flat = jnp.transpose(x, (1, 2, 0)).reshape(-1, D)             # (N, D), N = T*B
    N = flat.shape[0]

    K_pad = _round_up(K, _LANE)
    D_pad = _round_up(D, _LANE)
    vmem_limit = _vmem_limit_bytes()
    TN = _choose_tile_n(N, K_pad, D_pad, emit_distances=return_distances,
                        vmem_limit_bytes=vmem_limit)
    num_tiles = -(-N // TN)

    # Lane-pad the feature axis only when needed; rows are never padded (ragged
    # last tile is masked in-kernel, OOB output rows are dropped by Pallas).
    flat_in = flat if D_pad == D else (
        jnp.zeros((N, D_pad), jnp.float32).at[:, :D].set(flat))
    e_in = embedding if (K_pad == K and D_pad == D) else (
        jnp.zeros((K_pad, D_pad), jnp.float32).at[:K, :D].set(embedding))

    # ||e||^2 hoisted out of the per-tile body; padded codes masked out of argmin.
    e2 = jnp.sum(e_in * e_in, axis=1)
    e2 = (e2 + jnp.where(jnp.arange(K_pad) < K, 0.0, _BIG))[None, :]   # (1, K_pad)

    kernel = functools.partial(
        _vq_tile_kernel, n_valid=N, tile_n=TN,
        dist_matmul_dtype=jnp.bfloat16 if bf16_distance_matmul else jnp.float32,
        emit_distances=return_distances)

    out_shape = []
    out_specs = []
    if return_distances:
        out_shape.append(jax.ShapeDtypeStruct((N, K_pad), jnp.float32))
        out_specs.append(pl.BlockSpec((TN, K_pad), lambda i: (i, 0)))
    out_shape += [
        jax.ShapeDtypeStruct((num_tiles, 1, TN), jnp.int32),       # indices (lane-dense)
        jax.ShapeDtypeStruct((N, D_pad), jnp.float32),             # quantized (flat)
        jax.ShapeDtypeStruct((num_tiles, 1, K_pad), jnp.float32),  # per-tile counts
        jax.ShapeDtypeStruct((num_tiles, 1, _LANE), jnp.float32),  # per-tile sum sq err
    ]
    out_specs += [
        pl.BlockSpec((1, 1, TN), lambda i: (i, 0, 0)),
        pl.BlockSpec((TN, D_pad), lambda i: (i, 0)),
        pl.BlockSpec((1, 1, K_pad), lambda i: (i, 0, 0)),
        pl.BlockSpec((1, 1, _LANE), lambda i: (i, 0, 0)),
    ]

    outs = pl.pallas_call(
        kernel,
        grid=(num_tiles,),
        out_shape=tuple(out_shape),
        in_specs=[
            pl.BlockSpec((TN, D_pad), lambda i: (i, 0)),
            # Constant-index residents: single-buffered to halve their VMEM cost.
            pl.BlockSpec((K_pad, D_pad), lambda i: (0, 0),
                         pipeline_mode=pl.Buffered(1)),
            pl.BlockSpec((1, K_pad), lambda i: (0, 0),
                         pipeline_mode=pl.Buffered(1)),
        ],
        out_specs=tuple(out_specs),
        compiler_params=pltpu.CompilerParams(
            dimension_semantics=("parallel",),
            vmem_limit_bytes=vmem_limit),
    )(flat_in, e_in, e2)

    outs = list(outs)
    dist = outs.pop(0) if return_distances else None
    idx_t, q_pad, cnt_t, sse_t = outs

    # Finish the (tiny) cross-tile reductions on the host graph.
    counts = jnp.sum(cnt_t[:, 0, :K], axis=0)                     # (K,)
    avg_probs = counts / jnp.float32(N)
    perplexity = jnp.exp(-jnp.sum(avg_probs * jnp.log(avg_probs + 1e-10)))

    sse = jnp.sum(sse_t[:, 0, 0])
    e_latent_loss = sse / jnp.float32(N * D)
    vq_loss = jnp.asarray(commitment_cost, jnp.float32) * e_latent_loss

    q_flat = q_pad if D_pad == D else q_pad[:, :D]                # (N, D)
    idx = idx_t[:, 0, :].reshape(-1)[:N][:, None]                 # (N, 1) int32

    # Straight-through estimator: forward value == quantized, grads flow to inputs.
    q_ste = flat + lax.stop_gradient(q_flat - flat)
    quantized_out = jnp.transpose(q_ste.reshape(D, T, B), (2, 0, 1))   # (B, D, T)

    # One-hot encodings are rebuilt from the indices only when requested; the
    # kernel never writes the dense N x K one-hot to HBM.
    encodings_out = (jax.nn.one_hot(idx[:, 0], K, dtype=jnp.float32)
                     .reshape(B, T, K) if return_encodings else None)
    distances_out = dist[:, :K].reshape(B, T, K) if return_distances else None
    concatenated_quantized = q_flat                               # == embedding[argmin]

    return (vq_loss, quantized_out, perplexity,
            encodings_out, distances_out, idx, concatenated_quantized)


if __name__ == "__main__":
    # Small, deterministic configuration.
    num_embeddings = 32      # K
    embedding_dim = 8        # D
    batch = 2                # B
    time = 16                # T
    commitment_cost = 0.25

    key = jax.random.PRNGKey(0)
    k_emb, k_x = jax.random.split(key)
    # nn.Embedding(...).weight.data.normal_() -> standard-normal codebook.
    embedding = jax.random.normal(k_emb, (num_embeddings, embedding_dim),
                                  dtype=jnp.float32)
    x = jax.random.normal(k_x, (batch, embedding_dim, time), dtype=jnp.float32)

    outs = vector_quantizer_ema_forward(x, embedding, commitment_cost)
    outs = jax.block_until_ready(outs)
    vq_loss, quantized, perplexity, encodings, distances, indices, cat_q = outs

    N = batch * time
    assert quantized.shape == (batch, embedding_dim, time)
    assert encodings.shape == (batch, time, num_embeddings)
    assert distances.shape == (batch, time, num_embeddings)
    assert indices.shape == (N, 1)
    assert cat_q.shape == (N, embedding_dim)
    assert bool(jnp.isfinite(vq_loss)) and bool(jnp.isfinite(perplexity))
    assert bool(jnp.all(jnp.sum(encodings, axis=-1) == 1.0))
    assert bool(jnp.all((indices >= 0) & (indices < num_embeddings)))

    # Quantized rows must be exact codebook rows selected by the indices.
    gathered = embedding[indices[:, 0]]
    assert bool(jnp.allclose(cat_q, gathered, atol=1e-6))

    # Kernel distances vs. an f32 reference (bf16 cross term -> loose tolerance).
    flat = jnp.transpose(x, (1, 2, 0)).reshape(-1, embedding_dim)
    d_ref = (jnp.sum(flat ** 2, axis=1, keepdims=True)
             + jnp.sum(embedding ** 2, axis=1) - 2.0 * flat @ embedding.T)
    assert bool(jnp.allclose(distances.reshape(N, -1), d_ref, rtol=2e-2, atol=0.1))

    # Loss / perplexity consistency.
    loss_ref = commitment_cost * jnp.mean((gathered - flat) ** 2)
    assert bool(jnp.allclose(vq_loss, loss_ref, rtol=1e-5, atol=1e-6))
    probs_ref = jnp.mean(encodings.reshape(N, -1), axis=0)
    ppl_ref = jnp.exp(-jnp.sum(probs_ref * jnp.log(probs_ref + 1e-10)))
    assert bool(jnp.allclose(perplexity, ppl_ref, rtol=1e-5, atol=1e-6))

    # Lean path: no dense distances / one-hot written to HBM or returned.
    lean = vector_quantizer_ema_forward(x, embedding, commitment_cost,
                                        return_distances=False,
                                        return_encodings=False)
    lean = jax.block_until_ready(lean)
    assert lean[3] is None and lean[4] is None
    assert bool(jnp.array_equal(lean[5], indices))
    assert bool(jnp.allclose(lean[1], quantized, atol=1e-6))

    print("KERNEL_OK")
</pallas_src>

<mosaic_0001>
module attributes {stable_mosaic.version = 11 : i64} {
  func.func @_vq_tile_kernel(%arg0: i32, %arg1: memref<32x128xf32, #tpu.memory_space<vmem>>, %arg2: memref<128x128xf32, #tpu.memory_space<vmem>>, %arg3: memref<1x128xf32, #tpu.memory_space<vmem>>, %arg4: memref<32x128xf32, #tpu.memory_space<vmem>>, %arg5: memref<1x1x32xi32, #tpu.memory_space<vmem>>, %arg6: memref<32x128xf32, #tpu.memory_space<vmem>>, %arg7: memref<1x1x128xf32, #tpu.memory_space<vmem>>, %arg8: memref<1x1x128xf32, #tpu.memory_space<vmem>>) attributes {dimension_semantics = [#tpu.dimension_semantics<parallel>], iteration_bounds = array<i64: 1>, scalar_prefetch = 0 : i64, scratch_operands = 0 : i64, tpu.core_type = #tpu.core_type<tc>, window_params = [{transform_indices = @transform_0, window_bounds = array<i64: 32, 128>}, {pipeline_mode = #tpu.pipeline_mode<synchronous>, transform_indices = @transform_1, window_bounds = array<i64: 128, 128>}, {pipeline_mode = #tpu.pipeline_mode<synchronous>, transform_indices = @transform_2, window_bounds = array<i64: 1, 128>}, {transform_indices = @transform_3, window_bounds = array<i64: 32, 128>}, {transform_indices = @transform_4, window_bounds = array<i64: 1, 1, 32>}, {transform_indices = @transform_5, window_bounds = array<i64: 32, 128>}, {transform_indices = @transform_6, window_bounds = array<i64: 1, 1, 128>}, {transform_indices = @transform_7, window_bounds = array<i64: 1, 1, 128>}]} {
    %c0 = arith.constant 0 : index
    %c0_0 = arith.constant 0 : index
    %0 = vector.load %arg1[%c0, %c0_0] : memref<32x128xf32, #tpu.memory_space<vmem>>, vector<32x128xf32>
    %c0_1 = arith.constant 0 : index
    %c0_2 = arith.constant 0 : index
    %1 = vector.load %arg2[%c0_1, %c0_2] : memref<128x128xf32, #tpu.memory_space<vmem>>, vector<128x128xf32>
    %c0_3 = arith.constant 0 : index
    %c0_4 = arith.constant 0 : index
    %2 = vector.load %arg3[%c0_3, %c0_4] : memref<1x128xf32, #tpu.memory_space<vmem>>, vector<1x128xf32>
    %3 = arith.truncf %0 : vector<32x128xf32> to vector<32x128xbf16>
    %4 = arith.truncf %1 : vector<128x128xf32> to vector<128x128xbf16>
    %cst = arith.constant dense<0.000000e+00> : vector<32x128xf32>
    %5 = tpu.matmul %3, %4, %cst {dimension_numbers = #tpu.dot_dimension_numbers<[1], [1], [0], [0], [0, 0, 1, 0], [], []>} : vector<32x128xbf16>, vector<128x128xbf16>, vector<32x128xf32> -> vector<32x128xf32>
    %6 = arith.mulf %0, %0 : vector<32x128xf32>
    %cst_5 = arith.constant dense<0.000000e+00> : vector<32xf32>
    %7 = vector.multi_reduction <add>, %6, %cst_5 [1] : vector<32x128xf32> to vector<32xf32>
    %8 = vector.shape_cast %7 : vector<32xf32> to vector<32x1xf32>
    %9 = vector.broadcast %8 : vector<32x1xf32> to vector<32x128xf32>
    %10 = vector.broadcast %2 : vector<1x128xf32> to vector<32x128xf32>
    %11 = arith.addf %9, %10 : vector<32x128xf32>
    %cst_6 = arith.constant 2.000000e+00 : f32
    %12 = vector.broadcast %cst_6 : f32 to vector<32x128xf32>
    %13 = arith.mulf %12, %5 : vector<32x128xf32>
    %14 = arith.subf %11, %13 : vector<32x128xf32>
    %c0_7 = arith.constant 0 : index
    %c0_8 = arith.constant 0 : index
    %15 = vector.load %arg4[%c0_7, %c0_8] : memref<32x128xf32, #tpu.memory_space<vmem>>, vector<32x128xf32>
    tpu.vector_store %arg4[%c0_7, %c0_8], %14 {strides = array<i32>} : memref<32x128xf32, #tpu.memory_space<vmem>>, vector<32x128xf32>,
    %16 = tpu.iota {dimensions = array<i32: 1>} : vector<32x128xi32>
    %cst_9 = arith.constant dense<0x7F800000> : vector<32xf32>
    %17 = vector.multi_reduction <minimumf>, %14, %cst_9 [1] : vector<32x128xf32> to vector<32xf32>
    %18 = vector.shape_cast %17 : vector<32xf32> to vector<32x1xf32>
    %19 = vector.broadcast %18 : vector<32x1xf32> to vector<32x128xf32>
    %20 = arith.cmpf oeq, %14, %19 : vector<32x128xf32>
    %c128_i32 = arith.constant 128 : i32
    %21 = vector.broadcast %c128_i32 : i32 to vector<32x128xi32>
    %22 = arith.select %20, %16, %21 : vector<32x128xi1>, vector<32x128xi32>
    %cst_10 = arith.constant dense<2147483647> : vector<32xi32>
    %23 = vector.multi_reduction <minsi>, %22, %cst_10 [1] : vector<32x128xi32> to vector<32xi32>
    %24 = vector.shape_cast %23 : vector<32xi32> to vector<1x1x32xi32>
    %c0_11 = arith.constant 0 : index
    %c0_12 = arith.constant 0 : index
    %c0_13 = arith.constant 0 : index
    %25 = vector.load %arg5[%c0_11, %c0_12, %c0_13] : memref<1x1x32xi32, #tpu.memory_space<vmem>>, vector<1x1x32xi32>
    tpu.vector_store %arg5[%c0_11, %c0_12, %c0_13], %24 {strides = array<i32>} : memref<1x1x32xi32, #tpu.memory_space<vmem>>, vector<1x1x32xi32>,
    %26 = vector.shape_cast %23 : vector<32xi32> to vector<32x1xi32>
    %27 = vector.broadcast %26 : vector<32x1xi32> to vector<32x128xi32>
    %28 = arith.cmpi eq, %16, %27 : vector<32x128xi32>
    %29 = arith.extui %28 : vector<32x128xi1> to vector<32x128xi32>
    %30 = arith.sitofp %29 : vector<32x128xi32> to vector<32x128xf32>
    %cst_14 = arith.constant dense<0.000000e+00> : vector<32x128xf32>
    %31 = tpu.matmul %30, %1, %cst_14 {dimension_numbers = #tpu.dot_dimension_numbers<[1], [0], [0], [1], [0, 0, 1, 1], [], []>} : vector<32x128xf32>, vector<128x128xf32>, vector<32x128xf32> -> vector<32x128xf32>
    %c0_15 = arith.constant 0 : index
    %c0_16 = arith.constant 0 : index
    %32 = vector.load %arg6[%c0_15, %c0_16] : memref<32x128xf32, #tpu.memory_space<vmem>>, vector<32x128xf32>
    tpu.vector_store %arg6[%c0_15, %c0_16], %31 {strides = array<i32>} : memref<32x128xf32, #tpu.memory_space<vmem>>, vector<32x128xf32>,
    %c32_i32 = arith.constant 32 : i32
    %33 = arith.muli %arg0, %c32_i32 : i32
    %34 = tpu.iota {dimensions = array<i32: 0>} : vector<32x1xi32>
    %35 = vector.broadcast %33 : i32 to vector<32x1xi32>
    %36 = arith.addi %35, %34 : vector<32x1xi32>
    %c32_i32_17 = arith.constant 32 : i32
    %37 = vector.broadcast %c32_i32_17 : i32 to vector<32x1xi32>
    %38 = arith.cmpi slt, %36, %37 : vector<32x1xi32>
    %39 = arith.extui %38 : vector<32x1xi1> to vector<32x1xi32>
    %40 = arith.sitofp %39 : vector<32x1xi32> to vector<32x1xf32>
    %41 = vector.broadcast %40 : vector<32x1xf32> to vector<32x128xf32>
    %42 = arith.mulf %30, %41 : vector<32x128xf32>
    %cst_18 = arith.constant dense<0.000000e+00> : vector<128xf32>
    %43 = vector.multi_reduction <add>, %42, %cst_18 [0] : vector<32x128xf32> to vector<128xf32>
    %44 = vector.shape_cast %43 : vector<128xf32> to vector<1x1x128xf32>
    %c0_19 = arith.constant 0 : index
    %c0_20 = arith.constant 0 : index
    %c0_21 = arith.constant 0 : index
    %45 = vector.load %arg7[%c0_19, %c0_20, %c0_21] : memref<1x1x128xf32, #tpu.memory_space<vmem>>, vector<1x1x128xf32>
    tpu.vector_store %arg7[%c0_19, %c0_20, %c0_21], %44 {strides = array<i32>} : memref<1x1x128xf32, #tpu.memory_space<vmem>>, vector<1x1x128xf32>,
    %46 = arith.subf %31, %0 : vector<32x128xf32>
    %47 = vector.broadcast %40 : vector<32x1xf32> to vector<32x128xf32>
    %48 = arith.mulf %46, %47 : vector<32x128xf32>
    %49 = arith.mulf %48, %48 : vector<32x128xf32>
    %50 = vector.shape_cast %49 : vector<32x128xf32> to vector<1x32x128xf32>
    %cst_22 = arith.constant dense<0.000000e+00> : vector<1xf32>
    %51 = vector.multi_reduction <add>, %50, %cst_22 [1, 2] : vector<1x32x128xf32> to vector<1xf32>
    %52 = vector.shape_cast %51 : vector<1xf32> to vector<1x1x1xf32>
    %53 = vector.extract %52[0, 0, 0] : f32 from vector<1x1x1xf32>
    %54 = vector.broadcast %53 : f32 to vector<1x1x128xf32>
    %c0_23 = arith.constant 0 : index
    %c0_24 = arith.constant 0 : index
    %c0_25 = arith.constant 0 : index
    %55 = vector.load %arg8[%c0_23, %c0_24, %c0_25] : memref<1x1x128xf32, #tpu.memory_space<vmem>>, vector<1x1x128xf32>
    tpu.vector_store %arg8[%c0_23, %c0_24, %c0_25], %54 {strides = array<i32>} : memref<1x1x128xf32, #tpu.memory_space<vmem>>, vector<1x1x128xf32>,
    return
  }
  func.func @transform_0(%arg0: i32) -> (i32, i32) {
    %c0_i32 = arith.constant 0 : i32
    %c0_i32_0 = arith.constant 0 : i32
    return %arg0, %c0_i32 : i32, i32
  }
  func.func @transform_1(%arg0: i32) -> (i32, i32) {
    %c0_i32 = arith.constant 0 : i32
    %c0_i32_0 = arith.constant 0 : i32
    %c0_i32_1 = arith.constant 0 : i32
    return %c0_i32, %c0_i32_0 : i32, i32
  }
  func.func @transform_2(%arg0: i32) -> (i32, i32) {
    %c0_i32 = arith.constant 0 : i32
    %c0_i32_0 = arith.constant 0 : i32
    %c0_i32_1 = arith.constant 0 : i32
    return %c0_i32, %c0_i32_0 : i32, i32
  }
  func.func @transform_3(%arg0: i32) -> (i32, i32) {
    %c0_i32 = arith.constant 0 : i32
    %c0_i32_0 = arith.constant 0 : i32
    return %arg0, %c0_i32 : i32, i32
  }
  func.func @transform_4(%arg0: i32) -> (i32, i32, i32) {
    %c0_i32 = arith.constant 0 : i32
    %c0_i32_0 = arith.constant 0 : i32
    %c0_i32_1 = arith.constant 0 : i32
    return %arg0, %c0_i32, %c0_i32_0 : i32, i32, i32
  }
  func.func @transform_5(%arg0: i32) -> (i32, i32) {
    %c0_i32 = arith.constant 0 : i32
    %c0_i32_0 = arith.constant 0 : i32
    return %arg0, %c0_i32 : i32, i32
  }
  func.func @transform_6(%arg0: i32) -> (i32, i32, i32) {
    %c0_i32 = arith.constant 0 : i32
    %c0_i32_0 = arith.constant 0 : i32
    %c0_i32_1 = arith.constant 0 : i32
    return %arg0, %c0_i32, %c0_i32_0 : i32, i32, i32
  }
  func.func @transform_7(%arg0: i32) -> (i32, i32, i32) {
    %c0_i32 = arith.constant 0 : i32
    %c0_i32_0 = arith.constant 0 : i32
    %c0_i32_1 = arith.constant 0 : i32
    return %arg0, %c0_i32, %c0_i32_0 : i32, i32, i32
  }
}

</mosaic_0001>

<bundles_post_ra>
// kernel: tpu_custom_call.1
= control target key start
LH: loop header
LB: loop body
LE: loop exit
PB: predicated region body
PF: predicated region fallthrough
CT: control target
= control target key end

     0   :  { %13 = vsyncpa [#allocation3], 0  ;;  %s1006_s0 = inlined_call_operand.hbm [shape: f32[32,128], index: 0, kind: input, shape index: {}]   ;;  %s1007_s1 = inlined_call_operand.hbm [shape: f32[128,128], index: 1, kind: input, shape index: {}]   ;;  %s1008_s2 = inlined_call_operand.vmem [shape: f32[1,128], index: 2, kind: input, shape index: {}]   ;;  %s1009_s3 = inlined_call_operand.hbm [shape: f32[32,128], index: 3, kind: output, shape index: {0}]   ;;  %s1010_s4 = inlined_call_operand.hbm [shape: s32[1,1,32], index: 4, kind: output, shape index: {1}]   ;;  %s1011_s5 = inlined_call_operand.hbm [shape: f32[32,128], index: 5, kind: output, shape index: {2}]   ;;  %s1012_s6 = inlined_call_operand.hbm [shape: f32[1,1,128], index: 6, kind: output, shape index: {3}]   ;;  %s1013_s7 = inlined_call_operand.hbm [shape: f32[1,1,128], index: 7, kind: output, shape index: {4}]  }
   0x1   :  { %14 = vsyncpa [#allocation6], 0 }
   0x2   :  { %15 = vsyncpa [#allocation4], 0 }
   0x3   :  { %16 = vsyncpa [#allocation9], 0 }
   0x4   :  { %17 = vsyncpa [#allocation12], 0  ;;  %s810_s24 = smov [#allocation2]   ;;  %s646_s28 = scalar_lea.hbm %s1006_s0, 512 }
   0x5   :  { %s23_s25 = sshll.u32 %s810_s24, 4  ;;  %p647_p0 = scmp.ne.s32.totalorder %s1006_s0, %s646_s28  ;;  %s24_s25 = int_to_ptr.vmem [resolvable:$true] %s23_s25 }
   0x6   :  { %p650_p1 = scmp.lt.u32.totalorder %s646_s28, %s1006_s0 }
   0x8   :  { %p652_p2 = pnand %p650_p1, %p647_p0 }
   0xa   :  { %655 = shalt.err (!%p652_p2)
}
   0xb   :  { %s656_s10 = scalar_lea.vmem %s24_s25, 512  ;;  %p661_p4 = scmp.lt.s32.totalorder %s24_s25, %s24_s25 }
   0xc   :  { %p657_p3 = scmp.ne.s32.totalorder %s24_s25, %s656_s10  ;;  %p662_p5 = scmp.lt.s32.totalorder %s656_s10, %s656_s10 }
   0xe   :  { %p663_p6 = por %p662_p5, %p661_p4 }
  0x10   :  { %p664_p7 = pnand %p663_p6, %p657_p3 }
  0x12   :  { %667 = shalt.err (!%p664_p7)
}
  0x13   :  { %s811_s11 = smov 128   ;;  %s812_s12 = smov 8  }
  0x14   :  { %29 = dma.hbm_to_vmem [thread:$0]  %s1006_s0, 512, %s24_s25, [#allocation3], %s811_s11, %s811_s11, %s812_s12  }
  0x15   :  { %s813_s15 = smov [#allocation5]   ;;  %s668_s19 = scalar_lea.hbm %s1007_s1, 2048 }
  0x16   :  { %s35_s16 = sshll.u32 %s813_s15, 4  ;;  %p669_p8 = scmp.ne.s32.totalorder %s1007_s1, %s668_s19  ;;  %s36_s16 = int_to_ptr.vmem [resolvable:$true] %s35_s16 }
  0x17   :  { %p672_p9 = scmp.lt.u32.totalorder %s668_s19, %s1007_s1 }
  0x19   :  { %p674_p10 = pnand %p672_p9, %p669_p8 }
  0x1b   :  { %677 = shalt.err (!%p674_p10)
}
  0x1c   :  { %s678_s24 = scalar_lea.vmem %s36_s16, 2048  ;;  %p683_p12 = scmp.lt.s32.totalorder %s36_s16, %s36_s16 }
  0x1d   :  { %p679_p11 = scmp.ne.s32.totalorder %s36_s16, %s678_s24  ;;  %p684_p13 = scmp.lt.s32.totalorder %s678_s24, %s678_s24 }
  0x1f   :  { %p685_p0 = por %p684_p13, %p683_p12 }
  0x21   :  { %p686_p1 = pnand %p685_p0, %p679_p11 }
  0x23   :  { %689 = shalt.err (!%p686_p1)
}
  0x24   :  { %41 = dma.hbm_to_vmem [thread:$0]  %s1007_s1, 2048, %s36_s16, [#allocation6], %s811_s11, %s811_s11, %s812_s12  }
  0x25   :  { %800 = dma.done.wait [#allocation3], 512  }
  0x26   :  { %801 = vsyncadd [#allocation3], 4294966784 }
  0x27   :  { %802 = dma.done.wait [#allocation6], 2048  }
  0x28   :  { %803 = vsyncadd [#allocation6], 4294965248  ;;  %v55_v0 = vld [vmem:[#allocation5] sm:$0xff]  ;;  %v56_v1 = vld [vmem:[#allocation5 + $0x8] sm:$0xff]  ;;  %v165_v55 = vlaneseq  ;;  %vm248_vm9 = vcmask 130112   ;;  %vm255_vm11 = vcmask 195712  }
  0x29   :  { %v57_v2 = vld [vmem:[#allocation5 + $0x10] sm:$0xff]  ;;  %v74_v3 = vpack.c.bf16 %v56_v1, %v55_v0  ;;  %v58_v4 = vld [vmem:[#allocation5 + $0x18] sm:$0xff]  ;;  %v59_v6 = vld [vmem:[#allocation5 + $0x20] sm:$0xff]  ;;  %vm262_vm13 = vcmask 261312   ;;  %vm264_vm14 = vcmask 253952   ;;  %s817_s28 = smov [#allocation11]  }
  0x2a   :  { %v75_v5 = vpack.c.bf16 %v58_v4, %v57_v2  ;;  %v60_v7 = vld [vmem:[#allocation5 + $0x28] sm:$0xff]  ;;  %v891_v8 = vld [vmem:[#allocation2] sm:$0xff]  ;;  %v897_v11 = vld [vmem:[#allocation2 + $0x10] sm:$0xff]  ;;  %v914_v56 = vand.u32 127, %v165_v55  ;;  %s470_s29 = sshll.u32 %s817_s28, 4  ;;  %s471_s29 = int_to_ptr.vmem [resolvable:$true] %s470_s29 }
  0x2b   :  { %543 = vmatprep.subr.bf16.mxu0 %v74_v3  ;;  %602 = vmatprep.subr.bf16.mxu1 %v74_v3  ;;  %v893_v9 = vld [vmem:[#allocation2 + $0x8] sm:$0xff]  ;;  %v131_v12 = vmul.f32 %v891_v8, %v891_v8  ;;  %v133_v13 = vmul.f32 %v897_v11, %v897_v11  ;;  %v76_v14 = vpack.c.bf16 %v60_v7, %v59_v6  ;;  %v903_v15 = vld [vmem:[#allocation2 + $0x18] sm:$0xff]  ;;  %v61_v18 = vld [vmem:[#allocation5 + $0x30] sm:$0xff] }
  0x2c   :  { %544 = vmatpush3.bf16.xpose.msra.mxu0 %v74_v3  ;;  %604 = vmatpush3.bf16.msra.mxu1 %v74_v3  ;;  %v72_v10 = vpack.c.bf16 %v893_v9, %v891_v8  ;;  %v132_v16 = vmul.f32 %v893_v9, %v893_v9  ;;  %v134_v17 = vmul.f32 %v903_v15, %v903_v15  ;;  %v62_v19 = vld [vmem:[#allocation5 + $0x38] sm:$0xff]  ;;  %v63_v21 = vld [vmem:[#allocation5 + $0x40] sm:$0xff]  ;;  %v64_v22 = vld [vmem:[#allocation5 + $0x48] sm:$0xff] }
  0x2d   :  { %545 = vmatprep.subr.bf16.mxu0 %v75_v5  ;;  %606 = vmatprep.subr.bf16.mxu1 %v75_v5  ;;  %v77_v20 = vpack.c.bf16 %v62_v19, %v61_v18  ;;  %v78_v23 = vpack.c.bf16 %v64_v22, %v63_v21  ;;  %v65_v24 = vld [vmem:[#allocation5 + $0x50] sm:$0xff]  ;;  %v66_v25 = vld [vmem:[#allocation5 + $0x58] sm:$0xff]  ;;  %v67_v27 = vld [vmem:[#allocation5 + $0x60] sm:$0xff]  ;;  %v73_v33 = vpack.c.bf16 %v903_v15, %v897_v11 }
  0x2e   :  { %559 = vmatprep.mubr.bf16.mxu0 %v72_v10  ;;  %135 = vadd.xlane.f32.xlu0 %v131_v12  ;;  %v79_v26 = vpack.c.bf16 %v66_v25, %v65_v24  ;;  %v68_v28 = vld [vmem:[#allocation5 + $0x68] sm:$0xff]  ;;  %v69_v30 = vld [vmem:[#allocation5 + $0x70] sm:$0xff]  ;;  %v70_v31 = vld [vmem:[#allocation5 + $0x78] sm:$0xff] }
  0x2f   :  { %139 = vadd.xlane.f32.xlu1 %v133_v13  ;;  %v80_v29 = vpack.c.bf16 %v68_v28, %v67_v27  ;;  %v81_v32 = vpack.c.bf16 %v70_v31, %v69_v30  ;;  %v504_v36 = vld [vmem:[%s1008_s2] ss:$0 sm:$0xff]  ;;  %v243_v31 = vadd.s32 4294967288, %v914_v56  ;;  %s816_s2 = smov [#allocation8]  }
  0x30   :  { %608 = vmatpush3.bf16.msra.mxu1 %v75_v5  ;;  %s448_s27 = sshll.u32 %s816_s2, 4  ;;  %s449_s27 = int_to_ptr.vmem [resolvable:$true] %s448_s27 }
  0x31   :  { %610 = vmatprep.subr.bf16.mxu1 %v76_v14  ;;  %s690_s30 = scalar_lea.vmem %s449_s27, 16  ;;  %s694_s8 = scalar_lea.vmem %s449_s27, 32 }
  0x32   :  { %137 = vadd.xlane.f32.xlu0 %v132_v16  ;;  %p691_p2 = scmp.ne.s32.totalorder %s449_s27, %s690_s30  ;;  %p695_p3 = scmp.lt.s32.totalorder %s449_s27, %s449_s27 }
  0x33   :  { %141 = vadd.xlane.f32.xlu1 %v134_v17  ;;  %p696_p4 = scmp.lt.s32.totalorder %s694_s8, %s690_s30 }
  0x34   :  { %546 = vmatpush3.bf16.xpose.msra.mxu0 %v75_v5  ;;  %612 = vmatpush3.bf16.msra.mxu1 %v76_v14 }
  0x35   :  { %547 = vmatprep.subr.bf16.mxu0 %v76_v14  ;;  %614 = vmatprep.subr.bf16.mxu1 %v77_v20  ;;  %p697_p5 = por %p696_p4, %p695_p3 }
  0x37   :  { %p698_p6 = pnand %p697_p5, %p691_p2 }
  0x38   :  { %616 = vmatpush3.bf16.msra.mxu1 %v77_v20 }
  0x39   :  { %618 = vmatprep.subr.bf16.mxu1 %v78_v23 }
  0x3c   :  { %548 = vmatpush3.bf16.xpose.msra.mxu0 %v76_v14  ;;  %620 = vmatpush3.bf16.msra.mxu1 %v78_v23 }
  0x3d   :  { %549 = vmatprep.subr.bf16.mxu0 %v77_v20  ;;  %622 = vmatprep.subr.bf16.mxu1 %v79_v26 }
  0x40   :  { %624 = vmatpush3.bf16.msra.mxu1 %v79_v26 }
  0x41   :  { %626 = vmatprep.subr.bf16.mxu1 %v80_v29 }
  0x44   :  { %550 = vmatpush3.bf16.xpose.msra.mxu0 %v77_v20  ;;  %628 = vmatpush3.bf16.msra.mxu1 %v80_v29 }
  0x45   :  { %551 = vmatprep.subr.bf16.mxu0 %v78_v23  ;;  %630 = vmatprep.subr.bf16.mxu1 %v81_v32 }
  0x48   :  { %632 = vmatpush3.bf16.msra.mxu1 %v81_v32 }
  0x4c   :  { %552 = vmatpush3.bf16.xpose.msra.mxu0 %v78_v23 }
  0x4d   :  { %553 = vmatprep.subr.bf16.mxu0 %v79_v26 }
  0x54   :  { %554 = vmatpush3.bf16.xpose.msra.mxu0 %v79_v26 }
  0x55   :  { %555 = vmatprep.subr.bf16.mxu0 %v80_v29 }
  0x5c   :  { %556 = vmatpush3.bf16.xpose.msra.mxu0 %v80_v29 }
  0x5d   :  { %557 = vmatprep.subr.bf16.mxu0 %v81_v32 }
  0x64   :  { %558 = vmatpush3.bf16.xpose.msra.mxu0 %v81_v32 }
  0x6b   :  { %560 = vmatmul.mubr.bf16.vlgmr.msra.gmra.mrb[0].mxu0 %v73_v33 }
  0xbb   :  { %v136_v35 = vpop.xlane.xlu0 %135 }
  0xbc   :  { %v140_v34 = vpop.xlane.xlu1 %139  ;;  %v149_v44 = vadd.f32 %v504_v36, %v136_v35 }
  0xbd   :  { %v151_v38 = vadd.f32 %v504_v36, %v140_v34  ;;  %v240_v34 = vshrl.u32 %v165_v55, 7 }
  0xbf   :  { %v138_v39 = vpop.xlane.xlu0 %137 }
  0xc0   :  { %v142_v37 = vpop.xlane.xlu1 %141  ;;  %v150_v47 = vadd.f32 %v504_v36, %v138_v39 }
  0xc1   :  { %v152_v43 = vadd.f32 %v504_v36, %v142_v37  ;;  %v250_v37 = vadd.s32 4294967280, %v914_v56 }
 0x13e   :  { %v561_v40 = vpop.f32.mrb[0].mxu0 }
 0x13f   :  { %v155_v41 = vmul.f32 2.0, %v561_v40  ;;  %v116_v42 = vpop.f32.mrb[1].mxu0 }
 0x140   :  { %v153_v45 = vmul.f32 2.0, %v116_v42  ;;  %v562_v46 = vpop.f32.mrb[2].mxu0  ;;  %v246_v42 = vsub.s32 %v243_v31, %v240_v34 }
 0x141   :  { %v159_v48 = vsub.f32 %v151_v38, %v155_v41  ;;  %v156_v49 = vmul.f32 2.0, %v562_v46  ;;  %v119_v50 = vpop.f32.mrb[3].mxu0  ;;  %v257_v41 = vadd.s32 4294967272, %v914_v56 }
 0x142   :  { %v157_v51 = vsub.f32 %v149_v44, %v153_v45  ;;  %v154_v52 = vmul.f32 2.0, %v119_v50 }
 0x143   :  { %163 = vst [vmem:[#allocation7 + $0x10] sm:$0xff] %v159_v48  ;;  %v160_v53 = vsub.f32 %v152_v43, %v156_v49  ;;  %v253_v49 = vsub.s32 %v250_v37, %v240_v34 }
 0x144   :  { %161 = vst [vmem:[#allocation7] sm:$0xff] %v157_v51  ;;  %v158_v54 = vsub.f32 %v150_v47, %v154_v52  ;;  %167 = vmin.xlane.f32.xlu0 %v157_v51  ;;  %v241_v47 = vsub.s32 %v914_v56, %v240_v34  ;;  %v814_v52 = vmov 1.0  }
 0x145   :  { %164 = vst [vmem:[#allocation7 + $0x18] sm:$0xff] %v160_v53 }
 0x146   :  { %162 = vst [vmem:[#allocation7 + $0x8] sm:$0xff] %v158_v54  ;;  %169 = vmin.xlane.f32.xlu1 %v158_v54 }
 0x148   :  { %171 = vmin.xlane.f32.xlu0 %v159_v48 }
 0x14a   :  { %173 = vmin.xlane.f32.xlu1 %v160_v53 }
 0x1d1   :  { %v168_v57 = vpop.xlane.xlu0 %167 }
 0x1d2   :  { %vm175_vm0 = vcmp.eq.f32.partialorder %v157_v51, %v168_v57 }
 0x1d3   :  { %v179_v58 = vsel %vm175_vm0, %v914_v56, 128  ;;  %v170_v59 = vpop.xlane.xlu1 %169 }
 0x1d4   :  { %vm176_vm1 = vcmp.eq.f32.partialorder %v158_v54, %v170_v59  ;;  %v184_v60 = vshra.s32 %v179_v58, 16  ;;  %v183_v12 = vand.u32 65535, %v179_v58 }
 0x1d5   :  { %v180_v61 = vsel %vm176_vm1, %v914_v56, 128  ;;  %v172_v62 = vpop.xlane.xlu0 %171 }
 0x1d6   :  { %vm177_vm2 = vcmp.eq.f32.partialorder %v159_v48, %v172_v62  ;;  %v186_v63 = vcvt.s32.f32 %v184_v60  ;;  %v198_v0 = vshra.s32 %v180_v61, 16  ;;  %v197_v13 = vand.u32 65535, %v180_v61 }
 0x1d7   :  { %v181_v1 = vsel %vm177_vm2, %v914_v56, 128  ;;  %v174_v2 = vpop.xlane.xlu1 %173  ;;  %v185_v17 = vcvt.s32.f32 %v183_v12  ;;  %v815_v60 = vmov 0.0  }
 0x1d8   :  { %vm178_vm3 = vcmp.eq.f32.partialorder %v160_v53, %v174_v2  ;;  %187 = vmin.xlane.f32.xlu0 %v186_v63  ;;  %v200_v3 = vcvt.s32.f32 %v198_v0  ;;  %v212_v4 = vshra.s32 %v181_v1, 16  ;;  %v211_v14 = vand.u32 65535, %v181_v1 }
 0x1d9   :  { %v182_v5 = vsel %vm178_vm3, %v914_v56, 128  ;;  %v199_v21 = vcvt.s32.f32 %v197_v13  ;;  %v260_v53 = vsub.s32 %v257_v41, %v240_v34 }
 0x1da   :  { %201 = vmin.xlane.f32.xlu1 %v200_v3  ;;  %v214_v6 = vcvt.s32.f32 %v212_v4  ;;  %v226_v7 = vshra.s32 %v182_v5, 16  ;;  %v225_v18 = vand.u32 65535, %v182_v5  ;;  %v213_v24 = vcvt.s32.f32 %v211_v14 }
 0x1dc   :  { %215 = vmin.xlane.f32.xlu0 %v214_v6  ;;  %v228_v10 = vcvt.s32.f32 %v226_v7  ;;  %v227_v27 = vcvt.s32.f32 %v225_v18 }
 0x1de   :  { %229 = vmin.xlane.f32.xlu1 %v228_v10 }
 0x265   :  { %v188_v16 = vpop.xlane.xlu0 %187 }
 0x266   :  { %vm189_vm4 = vcmp.eq.f32.partialorder %v186_v63, %v188_v16  ;;  %v194_v29 = vcvt.f32.s32 %v188_v16 }
 0x267   :  { %v202_v19 = vpop.xlane.xlu1 %201  ;;  %v190_v20 = vsel %vm189_vm4, %v185_v17, inf }
 0x268   :  { %191 = vmin.xlane.f32.xlu0 %v190_v20  ;;  %vm203_vm5 = vcmp.eq.f32.partialorder %v200_v3, %v202_v19  ;;  %v208_v30 = vcvt.f32.s32 %v202_v19  ;;  %v195_v35 = vshll.u32 %v194_v29, 16 }
 0x269   :  { %v216_v22 = vpop.xlane.xlu0 %215  ;;  %v204_v23 = vsel %vm203_vm5, %v199_v21, inf }
 0x26a   :  { %205 = vmin.xlane.f32.xlu1 %v204_v23  ;;  %vm217_vm6 = vcmp.eq.f32.partialorder %v214_v6, %v216_v22  ;;  %v222_v32 = vcvt.f32.s32 %v216_v22  ;;  %v209_v38 = vshll.u32 %v208_v30, 16 }
 0x26b   :  { %v230_v25 = vpop.xlane.xlu1 %229  ;;  %v218_v26 = vsel %vm217_vm6, %v213_v24, inf }
 0x26c   :  { %219 = vmin.xlane.f32.xlu0 %v218_v26  ;;  %vm231_vm7 = vcmp.eq.f32.partialorder %v228_v10, %v230_v25  ;;  %v236_v39 = vcvt.f32.s32 %v230_v25  ;;  %v223_v45 = vshll.u32 %v222_v32, 16 }
 0x26d   :  { %v232_v28 = vsel %vm231_vm7, %v227_v27, inf }
 0x26e   :  { %233 = vmin.xlane.f32.xlu1 %v232_v28  ;;  %v237_v51 = vshll.u32 %v236_v39, 16 }
 0x2f5   :  { %v192_v33 = vpop.xlane.xlu0 %191 }
 0x2f6   :  { %v193_v36 = vcvt.f32.s32 %v192_v33 }
 0x2f7   :  { %v206_v40 = vpop.xlane.xlu1 %205 }
 0x2f8   :  { %v207_v43 = vcvt.f32.s32 %v206_v40  ;;  %v196_v44 = vadd.s32 %v195_v35, %v193_v36 }
 0x2f9   :  { %v220_v46 = vpop.xlane.xlu0 %219 }
 0x2fa   :  { %v210_v48 = vadd.s32 %v209_v38, %v207_v43  ;;  %v221_v50 = vcvt.f32.s32 %v220_v46  ;;  %vm266_vm8 = vcmp.eq.s32.totalorder %v914_v56, %v196_v44  ;;  %v242_v59 = vrot.slane %v196_v44, %v241_v47 }
 0x2fb   :  { %595 = vmatprep.mubr.msk.f32.mxu1 %vm266_vm8, %v814_v52  ;;  %v234_v54 = vpop.xlane.xlu1 %233  ;;  %v505_v61 = vsel %vm266_vm8, 1.0, %v815_v60 }
 0x2fc   :  { %v247_v55 = vrot.slane %v210_v48, %v246_v42  ;;  %v224_v57 = vadd.s32 %v223_v45, %v221_v50  ;;  %vm267_vm10 = vcmp.eq.s32.totalorder %v914_v56, %v210_v48  ;;  %v235_v58 = vcvt.f32.s32 %v234_v54 }
 0x2fd   :  { %v506_v62 = vsel %vm267_vm10, 1.0, %v815_v60  ;;  %596 = vmatmul.mubr.msk.f32.vlgmr.msra.gmra.mrb[0].mxu1 %vm267_vm10, %v814_v52 }
 0x2fe   :  { %v254_v63 = vrot.slane %v224_v57, %v253_v49  ;;  %v394_v0 = vadd.f32 %v506_v62, %v505_v61  ;;  %v238_v1 = vadd.s32 %v237_v51, %v235_v58  ;;  %vm268_vm12 = vcmp.eq.s32.totalorder %v914_v56, %v224_v57 }
 0x2ff   :  { %v507_v2 = vsel %vm268_vm12, 1.0, %v815_v60  ;;  %598 = vmatprep.mubr.msk.f32.mxu1 %vm268_vm12, %v814_v52  ;;  %v249_v3 = vsel %vm248_vm9, %v247_v55, %v242_v59 }
 0x300   :  { %v261_v4 = vrot.slane %v238_v1, %v260_v53  ;;  %v395_v5 = vadd.f32 %v507_v2, %v394_v0  ;;  %vm269_vm15 = vcmp.eq.s32.totalorder %v914_v56, %v238_v1  ;;  %v256_v6 = vsel %vm255_vm11, %v254_v63, %v249_v3 }
 0x301   :  { %v508_v7 = vsel %vm269_vm15, 1.0, %v815_v60  ;;  %599 = vmatmul.mubr.msk.f32.gmra.mrb[2].mxu1 %vm269_vm15, %v814_v52 }
 0x302   :  { %v396_v10 = vadd.f32 %v508_v7, %v395_v5  ;;  %v263_v12 = vsel %vm262_vm13, %v261_v4, %v256_v6 }
 0x303   :  { %265 = vst.msk [vmem:[#allocation8] sm:$0x1] %vm264_vm14, %v263_v12 }
 0x304   :  { %v397_v13 = vrot.slane %v396_v10, 4 }
 0x306   :  { %v398_v14 = vadd.f32 %v397_v13, %v396_v10 }
 0x308   :  { %v399_v16 = vrot.slane %v398_v14, 2 }
 0x30a   :  { %v400_v17 = vadd.f32 %v399_v16, %v398_v14 }
 0x30c   :  { %v401_v18 = vrot.slane %v400_v17, 1 }
 0x30e   :  { %v402_v19 = vadd.f32 %v401_v18, %v400_v17 }
 0x310   :  { %403 = vst [vmem:[#allocation11] sm:$0x1] %v402_v19 }
 0x3d0   :  { %v597_v20 = vpop.f32.mrb[0].mxu1 }
 0x3d1   :  { %364 = vst [vmem:[#allocation10 + $0x8] sm:$0xff] %v597_v20  ;;  %v405_v21 = vsub.f32 %v597_v20, %v893_v9  ;;  %v344_v22 = vpop.f32.mrb[1].mxu1 }
 0x3d2   :  { %363 = vst [vmem:[#allocation10] sm:$0xff] %v344_v22  ;;  %v404_v56 = vsub.f32 %v344_v22, %v891_v8 }
 0x3d3   :  { %v413_v23 = vmul.f32 %v405_v21, %v405_v21 }
 0x3d4   :  { %v412_v24 = vmul.f32 %v404_v56, %v404_v56  ;;  %v600_v25 = vpop.f32.mrb[2].mxu1 }
 0x3d5   :  { %366 = vst [vmem:[#allocation10 + $0x18] sm:$0xff] %v600_v25  ;;  %v354_v26 = vpop.f32.mrb[3].mxu1  ;;  %v407_v28 = vsub.f32 %v600_v25, %v903_v15 }
 0x3d6   :  { %v416_v27 = vadd.f32 %v413_v23, %v412_v24  ;;  %365 = vst [vmem:[#allocation10 + $0x10] sm:$0xff] %v354_v26  ;;  %v406_v29 = vsub.f32 %v354_v26, %v897_v11 }
 0x3d7   :  { %v415_v31 = vmul.f32 %v407_v28, %v407_v28 }
 0x3d8   :  { %v414_v30 = vmul.f32 %v406_v29, %v406_v29 }
 0x3da   :  { %v417_v32 = vadd.f32 %v416_v27, %v414_v30 }
 0x3dc   :  { %v418_v33 = vadd.f32 %v417_v32, %v415_v31 }
 0x3de   :  { %419 = vadd.xlane.f32.xlu0 %v418_v33 }
 0x3df   :  { %701 = shalt.err (!%p698_p6)
}
 0x3e0   :  { %s702_s13 = scalar_lea.hbm %s1010_s4, 16 }
 0x3e1   :  { %p703_p7 = scmp.ne.s32.totalorder %s1010_s4, %s702_s13  ;;  %p706_p8 = scmp.lt.u32.totalorder %s702_s13, %s1010_s4 }
 0x3e3   :  { %p708_p9 = pnand %p706_p8, %p703_p7 }
 0x3e5   :  { %711 = shalt.err (!%p708_p9)
}
 0x3e6   :  { %451 = dma.vmem_to_hbm [thread:$0]  %s449_s27, 16, %s1010_s4, [#allocation9]  }
 0x3e7   :  { %s712_s20 = scalar_lea.vmem %s471_s29, 16  ;;  %s716_s21 = scalar_lea.vmem %s471_s29, 32 }
 0x3e8   :  { %p713_p10 = scmp.ne.s32.totalorder %s471_s29, %s712_s20  ;;  %p717_p11 = scmp.lt.s32.totalorder %s471_s29, %s471_s29 }
 0x3e9   :  { %p718_p12 = scmp.lt.s32.totalorder %s716_s21, %s712_s20 }
 0x3eb   :  { %p719_p13 = por %p718_p12, %p717_p11 }
 0x3ed   :  { %p720_p0 = pnand %p719_p13, %p713_p10 }
 0x3ef   :  { %723 = shalt.err (!%p720_p0)
}
 0x3f0   :  { %s724_s24 = scalar_lea.hbm %s1012_s6, 16 }
 0x3f1   :  { %p725_p1 = scmp.ne.s32.totalorder %s1012_s6, %s724_s24  ;;  %p728_p2 = scmp.lt.u32.totalorder %s724_s24, %s1012_s6 }
 0x3f3   :  { %p730_p3 = pnand %p728_p2, %p725_p1 }
 0x3f5   :  { %733 = shalt.err (!%p730_p3)
}
 0x3f6   :  { %473 = dma.vmem_to_hbm [thread:$0]  %s471_s29, 16, %s1012_s6, [#allocation12]  }
 0x3f7   :  { %s818_s27 = smov [#allocation7]   ;;  %s819_s30 = smov [#allocation10]  }
 0x3f8   :  { %s435_s28 = sshll.u32 %s818_s27, 4  ;;  %s457_s8 = sshll.u32 %s819_s30, 4  ;;  %s436_s28 = int_to_ptr.vmem [resolvable:$true] %s435_s28  ;;  %s957_s8 = int_to_ptr.vmem [resolvable:$true] %s457_s8 }
 0x3f9   :  { %s734_s9 = scalar_lea.vmem %s436_s28, 512  ;;  %p739_p5 = scmp.lt.s32.totalorder %s436_s28, %s436_s28 }
 0x3fa   :  { %p735_p4 = scmp.ne.s32.totalorder %s436_s28, %s734_s9  ;;  %p740_p6 = scmp.lt.s32.totalorder %s734_s9, %s734_s9 }
 0x3fc   :  { %p741_p7 = por %p740_p6, %p739_p5 }
 0x3fe   :  { %p742_p8 = pnand %p741_p7, %p735_p4 }
 0x400   :  { %745 = shalt.err (!%p742_p8)
}
 0x401   :  { %s746_s14 = scalar_lea.hbm %s1009_s3, 512 }
 0x402   :  { %p747_p9 = scmp.ne.s32.totalorder %s1009_s3, %s746_s14  ;;  %p750_p10 = scmp.lt.u32.totalorder %s746_s14, %s1009_s3 }
 0x404   :  { %p752_p11 = pnand %p750_p10, %p747_p9 }
 0x406   :  { %755 = shalt.err (!%p752_p11)
}
 0x407   :  { %441 = dma.vmem_to_hbm [thread:$0]  %s436_s28, 512, %s1009_s3, [#allocation4], %s811_s11, %s811_s11, %s812_s12  }
 0x408   :  { %s756_s19 = scalar_lea.vmem %s957_s8, 512  ;;  %p761_p13 = scmp.lt.s32.totalorder %s957_s8, %s957_s8 }
 0x409   :  { %p757_p12 = scmp.ne.s32.totalorder %s957_s8, %s756_s19  ;;  %p762_p0 = scmp.lt.s32.totalorder %s756_s19, %s756_s19 }
 0x40b   :  { %p763_p1 = por %p762_p0, %p761_p13 }
 0x40d   :  { %p764_p2 = pnand %p763_p1, %p757_p12 }
 0x40f   :  { %767 = shalt.err (!%p764_p2)
}
 0x410   :  { %s768_s22 = scalar_lea.hbm %s1011_s5, 512 }
 0x411   :  { %p769_p3 = scmp.ne.s32.totalorder %s1011_s5, %s768_s22  ;;  %p772_p4 = scmp.lt.u32.totalorder %s768_s22, %s1011_s5 }
 0x413   :  { %p774_p5 = pnand %p772_p4, %p769_p3 }
 0x415   :  { %777 = shalt.err (!%p774_p5)
}
 0x416   :  { %463 = dma.vmem_to_hbm [thread:$0]  %s957_s8, 512, %s1011_s5, [#allocation9], %s811_s11, %s811_s11, %s812_s12  }
 0x417   :  { %s820_s26 = smov [#allocation13]  }
 0x418   :  { %s480_s4 = sshll.u32 %s820_s26, 4  ;;  %s481_s4 = int_to_ptr.vmem [resolvable:$true] %s480_s4 }
 0x419   :  { %s778_s27 = scalar_lea.vmem %s481_s4, 16  ;;  %s782_s28 = scalar_lea.vmem %s481_s4, 32 }
 0x41a   :  { %p779_p6 = scmp.ne.s32.totalorder %s481_s4, %s778_s27  ;;  %p783_p7 = scmp.lt.s32.totalorder %s481_s4, %s481_s4 }
 0x41b   :  { %p784_p8 = scmp.lt.s32.totalorder %s782_s28, %s778_s27 }
 0x41d   :  { %p785_p9 = por %p784_p8, %p783_p7 }
 0x41f   :  { %p786_p10 = pnand %p785_p9, %p779_p6 }
 0x46b   :  { %v420_v8 = vpop.xlane.xlu0 %419 }
 0x46c   :  { %v421_v9 = vrot.slane %v420_v8, 4 }
 0x46e   :  { %v422_v11 = vadd.f32 %v421_v9, %v420_v8 }
 0x470   :  { %v423_v15 = vrot.slane %v422_v11, 2 }
 0x472   :  { %v424_v34 = vadd.f32 %v423_v15, %v422_v11 }
 0x474   :  { %v425_v35 = vrot.slane %v424_v34, 1 }
 0x476   :  { %v426_v36 = vadd.f32 %v425_v35, %v424_v34 }
 0x478   :  { %633 = vpush %v426_v36 }
 0x4a9   :  { %s634_s2 = spop %633 }
 0x4aa   :  { %v428_v37 = vstv %s634_s2 }
 0x4ab   :  { %429 = vst [vmem:[#allocation13] sm:$0x1] %v428_v37 }
 0x4ac   :  { %789 = shalt.err (!%p786_p10)
}
 0x4ad   :  { %s790_s12 = scalar_lea.hbm %s1013_s7, 16 }
 0x4ae   :  { %p791_p11 = scmp.ne.s32.totalorder %s1013_s7, %s790_s12  ;;  %p794_p12 = scmp.lt.u32.totalorder %s790_s12, %s1013_s7 }
 0x4b0   :  { %p796_p13 = pnand %p794_p12, %p791_p11 }
 0x4b2   :  { %799 = shalt.err (!%p796_p13)
}
 0x4b3   :  { %483 = dma.vmem_to_hbm [thread:$0]  %s481_s4, 16, %s1013_s7, [#allocation12]  }
 0x4b4   :  { %804 = dma.done.wait [#allocation4], 512  }
 0x4b5   :  { %805 = vsyncadd [#allocation4], 4294966784 }
 0x4b6   :  { %806 = dma.done.wait [#allocation9], 528  }
 0x4b7   :  { %807 = vsyncadd [#allocation9], 4294966768 }
 0x4b8   :  { %808 = dma.done.wait [#allocation12], 32  }
 0x4b9   :  { %809 = vsyncadd [#allocation12], 4294967264 }
 0x4ba   :  { %499 = vsyncpa [#allocation3], 1 }
 0x4bb   :  { %500 = vsyncpa [#allocation6], 1 }
 0x4bc   :  { %501 = vsyncpa [#allocation4], 1 }
 0x4bd   :  { %502 = vsyncpa [#allocation9], 1 }
 0x4be   :  { %503 = vsyncpa [#allocation12], 1 }

</bundles_post_ra>
